<compile_context>
chip_gen: v6e
topology: v6e:2x2x1
jax: 0.10.0
libtpu: 0.0.40
codegen_flags: <defaults>
</compile_context>

<pallas_src>
import functools

import jax
import jax.numpy as jnp
from jax import lax
from jax.experimental import pallas as pl
from jax.experimental.pallas import tpu as pltpu


# ----------------------------------------------------------------------------
# 1. Hoisted input projection: gates_x = x2d @ W_ih^T + b   (parallel over rows)
# ----------------------------------------------------------------------------
def _proj_kernel(x_ref, w_ref, b_ref, out_ref):
    out_ref[...] = (jnp.dot(x_ref[...], w_ref[...],
                            preferred_element_type=jnp.float32)
                    + b_ref[...]).astype(out_ref.dtype)


def _input_projection(x2d, wih_t, b):
    """x2d: (T*B, D) -> (T*B, 4H) f32, combined LSTM bias folded in."""
    TB, D = x2d.shape
    G = wih_t.shape[1]                       # 4H
    Rb = TB if TB <= 512 else 512            # rows per block (full, or multiple of 8)
    return pl.pallas_call(
        _proj_kernel,
        out_shape=jax.ShapeDtypeStruct((TB, G), jnp.float32),
        grid_spec=pltpu.PrefetchScalarGridSpec(
            num_scalar_prefetch=0,
            grid=(pl.cdiv(TB, Rb),),
            in_specs=[
                pl.BlockSpec((Rb, D), lambda r: (r, 0)),   # row chunk of x
                pl.BlockSpec((D, G), lambda r: (0, 0)),    # W_ih^T (resident)
                pl.BlockSpec((1, G), lambda r: (0, 0)),    # combined bias
            ],
            out_specs=pl.BlockSpec((Rb, G), lambda r: (r, 0)),
        ),
        compiler_params=pltpu.CompilerParams(
            dimension_semantics=("parallel",)),            # embarrassingly parallel
    )(x2d, wih_t, b)


# ----------------------------------------------------------------------------
# 2. Sequential recurrence over chunked time axis
# ----------------------------------------------------------------------------
def _recurrent_kernel(gx_ref, whh_ref, out_ref, h_sc, c_sc,
                      *, Tc, T, H, needs_mask):
    chunk = pl.program_id(0)

    @pl.when(chunk == 0)
    def _():
        h_sc[...] = jnp.zeros_like(h_sc)
        c_sc[...] = jnp.zeros_like(c_sc)

    B = h_sc.shape[0]
    whh = whh_ref[...]                                   # (H, 4H), hoisted load

    # Single EUP pass per step over the whole lane-dense (B, 4H) gate slab:
    #   sigmoid(x) = 0.5 + 0.5 * tanh(0.5 * x)   for gates i, f, o;  gate g = tanh.
    # Pre-broadcast the per-gate scale/offset once (outside the unrolled loop).
    lane = lax.broadcasted_iota(jnp.int32, (B, 4 * H), 1)
    is_g = (lane >= 2 * H) & (lane < 3 * H)              # PyTorch gate order i,f,g,o
    pre = jnp.where(is_g, jnp.float32(1.0), jnp.float32(0.5))
    post_b = jnp.where(is_g, jnp.float32(0.0), jnp.float32(0.5))

    def step(t, carry):
        h, c = carry
        # Only the hidden-state matmul remains on the serial critical path.
        gates = gx_ref[t] + jnp.dot(h, whh, preferred_element_type=jnp.float32)
        act = jnp.tanh(gates * pre) * pre + post_b       # [sig, sig, tanh, sig]
        i = act[:, 0 * H:1 * H]
        f = act[:, 1 * H:2 * H]
        g = act[:, 2 * H:3 * H]
        o = act[:, 3 * H:4 * H]
        c_new = f * c + i * g
        h_new = o * jnp.tanh(c_new)
        if needs_mask:                                   # only traced if T % Tc != 0
            valid = (chunk * Tc + t) < T
            h_new = jnp.where(valid, h_new, h)
            c_new = jnp.where(valid, c_new, c)
        return (h_new, c_new)

    h, c = lax.fori_loop(0, Tc, step, (h_sc[...], c_sc[...]), unroll=True)
    h_sc[...] = h
    c_sc[...] = c
    out_ref[...] = h.astype(out_ref.dtype)               # last write wins


# ----------------------------------------------------------------------------
# 3. Final Linear on the last hidden state (separate tiny kernel)
# ----------------------------------------------------------------------------
def _fc_kernel(h_ref, w_ref, b_ref, out_ref):
    out_ref[...] = (jnp.dot(h_ref[...], w_ref[...],
                            preferred_element_type=jnp.float32)
                    + b_ref[...]).astype(out_ref.dtype)


def _fc(h, fcw_t, fcb):
    B = h.shape[0]
    return pl.pallas_call(
        _fc_kernel,
        out_shape=jax.ShapeDtypeStruct((B, fcw_t.shape[1]), jnp.float32),
    )(h, fcw_t, fcb)


# ----------------------------------------------------------------------------
# Wrapper
# ----------------------------------------------------------------------------
def lstm_forward(x, params, *, time_chunk=16):
    """x: (B, T, D) float32 (batch_first, like the PyTorch module)."""
    B, T, D = x.shape
    wih_t, whh_t, b, fcw_t, fcb = params
    H = whh_t.shape[0]
    G = 4 * H

    # Hoisted, fully parallel input projection over all T*B rows.
    x_tbd = jnp.transpose(x, (1, 0, 2))                  # (T, B, D)
    gx = _input_projection(x_tbd.reshape(T * B, D), wih_t, b)
    gx = gx.reshape(T, B, G)                             # (T, B, 4H), bias included

    # Chunk the time axis; pad to a multiple of Tc (masked inside the kernel).
    Tc = min(T, time_chunk)
    T_pad = pl.cdiv(T, Tc) * Tc
    if T_pad != T:
        gx = jnp.pad(gx, ((0, T_pad - T), (0, 0), (0, 0)))

    kernel = functools.partial(_recurrent_kernel, Tc=Tc, T=T, H=H,
                               needs_mask=(T_pad != T))

    h_last = pl.pallas_call(
        kernel,
        out_shape=jax.ShapeDtypeStruct((B, H), jnp.float32),
        grid_spec=pltpu.PrefetchScalarGridSpec(
            num_scalar_prefetch=0,
            grid=(T_pad // Tc,),
            in_specs=[
                pl.BlockSpec((Tc, B, G), lambda c: (c, 0, 0)),   # gates_x slab
                pl.BlockSpec((H, G), lambda c: (0, 0)),          # W_hh^T (resident)
            ],
            out_specs=pl.BlockSpec((B, H), lambda c: (0, 0)),
            scratch_shapes=[
                pltpu.VMEM((B, H), jnp.float32),   # h state (persists across grid)
                pltpu.VMEM((B, H), jnp.float32),   # c state
            ],
        ),
        compiler_params=pltpu.CompilerParams(
            dimension_semantics=("arbitrary",)),   # sequential recurrence over time
    )(gx, whh_t)

    # Final fc on the last timestep's hidden state.
    return _fc(h_last, fcw_t, fcb)


def init_params(key, input_dim, hidden_dim):
    """Deterministic init mimicking PyTorch's uniform(-1/sqrt(H), 1/sqrt(H))."""
    k = 1.0 / jnp.sqrt(jnp.float32(hidden_dim))
    keys = jax.random.split(key, 6)
    w_ih = jax.random.uniform(keys[0], (4 * hidden_dim, input_dim),
                              jnp.float32, -k, k)
    w_hh = jax.random.uniform(keys[1], (4 * hidden_dim, hidden_dim),
                              jnp.float32, -k, k)
    b_ih = jax.random.uniform(keys[2], (4 * hidden_dim,), jnp.float32, -k, k)
    b_hh = jax.random.uniform(keys[3], (4 * hidden_dim,), jnp.float32, -k, k)
    fc_w = jax.random.uniform(keys[4], (hidden_dim, hidden_dim),
                              jnp.float32, -k, k)
    fc_b = jax.random.uniform(keys[5], (hidden_dim,), jnp.float32, -k, k)
    # Kernel-friendly (right-multiply) layouts.
    return (w_ih.T,                                    # (D, 4H)
            w_hh.T,                                    # (H, 4H)
            (b_ih + b_hh).reshape(1, 4 * hidden_dim),  # (1, 4H)
            fc_w.T,                                    # (H, H)
            fc_b.reshape(1, hidden_dim))               # (1, H)


def reference_forward(x, params):
    """Pure-JAX reference (lax.scan) with identical semantics."""
    wih_t, whh_t, b, fcw_t, fcb = params
    B = x.shape[0]
    H = whh_t.shape[0]

    def step(carry, x_t):
        h, c = carry
        gates = x_t @ wih_t + h @ whh_t + b
        i = jax.nn.sigmoid(gates[:, 0 * H:1 * H])
        f = jax.nn.sigmoid(gates[:, 1 * H:2 * H])
        g = jnp.tanh(gates[:, 2 * H:3 * H])
        o = jax.nn.sigmoid(gates[:, 3 * H:4 * H])
        c = f * c + i * g
        h = o * jnp.tanh(c)
        return (h, c), None

    h0 = jnp.zeros((B, H), jnp.float32)
    c0 = jnp.zeros((B, H), jnp.float32)
    (h_last, _), _ = jax.lax.scan(step, (h0, c0), jnp.transpose(x, (1, 0, 2)))
    return h_last @ fcw_t + fcb


if __name__ == "__main__":
    B, T, D, H = 2, 8, 4, 32
    key = jax.random.PRNGKey(0)
    kx, kp = jax.random.split(key)
    x = jax.random.normal(kx, (B, T, D), jnp.float32)
    params = init_params(kp, D, H)

    out = jax.block_until_ready(lstm_forward(x, params))
    ref = jax.block_until_ready(reference_forward(x, params))

    assert out.shape == (B, H)
    assert jnp.allclose(out, ref, atol=1e-2, rtol=1e-2), "mismatch vs reference"

    print("KERNEL_OK")
</pallas_src>

<mosaic_0001>
module attributes {stable_mosaic.version = 11 : i64} {
  func.func @_proj_kernel(%arg0: i32, %arg1: memref<16x4xf32, #tpu.memory_space<vmem>>, %arg2: memref<4x128xf32, #tpu.memory_space<vmem>>, %arg3: memref<1x128xf32, #tpu.memory_space<vmem>>, %arg4: memref<16x128xf32, #tpu.memory_space<vmem>>) attributes {dimension_semantics = [#tpu.dimension_semantics<parallel>], iteration_bounds = array<i64: 1>, scalar_prefetch = 0 : i64, scratch_operands = 0 : i64, tpu.core_type = #tpu.core_type<tc>, window_params = [{transform_indices = @transform_0, window_bounds = array<i64: 16, 4>}, {pipeline_mode = #tpu.pipeline_mode<synchronous>, transform_indices = @transform_1, window_bounds = array<i64: 4, 128>}, {pipeline_mode = #tpu.pipeline_mode<synchronous>, transform_indices = @transform_2, window_bounds = array<i64: 1, 128>}, {transform_indices = @transform_3, window_bounds = array<i64: 16, 128>}]} {
    %c0 = arith.constant 0 : index
    %c0_0 = arith.constant 0 : index
    %0 = vector.load %arg1[%c0, %c0_0] : memref<16x4xf32, #tpu.memory_space<vmem>>, vector<16x4xf32>
    %c0_1 = arith.constant 0 : index
    %c0_2 = arith.constant 0 : index
    %1 = vector.load %arg2[%c0_1, %c0_2] : memref<4x128xf32, #tpu.memory_space<vmem>>, vector<4x128xf32>
    %cst = arith.constant dense<0.000000e+00> : vector<16x128xf32>
    %2 = tpu.matmul %0, %1, %cst {dimension_numbers = #tpu.dot_dimension_numbers<[1], [0], [0], [1], [0, 0, 1, 1], [], []>} : vector<16x4xf32>, vector<4x128xf32>, vector<16x128xf32> -> vector<16x128xf32>
    %c0_3 = arith.constant 0 : index
    %c0_4 = arith.constant 0 : index
    %3 = vector.load %arg3[%c0_3, %c0_4] : memref<1x128xf32, #tpu.memory_space<vmem>>, vector<1x128xf32>
    %4 = vector.broadcast %3 : vector<1x128xf32> to vector<16x128xf32>
    %5 = arith.addf %2, %4 : vector<16x128xf32>
    %c0_5 = arith.constant 0 : index
    %c0_6 = arith.constant 0 : index
    %6 = vector.load %arg4[%c0_5, %c0_6] : memref<16x128xf32, #tpu.memory_space<vmem>>, vector<16x128xf32>
    tpu.vector_store %arg4[%c0_5, %c0_6], %5 {strides = array<i32>} : memref<16x128xf32, #tpu.memory_space<vmem>>, vector<16x128xf32>,
    return
  }
  func.func @transform_0(%arg0: i32) -> (i32, i32) {
    %c0_i32 = arith.constant 0 : i32
    %c0_i32_0 = arith.constant 0 : i32
    return %arg0, %c0_i32 : i32, i32
  }
  func.func @transform_1(%arg0: i32) -> (i32, i32) {
    %c0_i32 = arith.constant 0 : i32
    %c0_i32_0 = arith.constant 0 : i32
    %c0_i32_1 = arith.constant 0 : i32
    return %c0_i32, %c0_i32_0 : i32, i32
  }
  func.func @transform_2(%arg0: i32) -> (i32, i32) {
    %c0_i32 = arith.constant 0 : i32
    %c0_i32_0 = arith.constant 0 : i32
    %c0_i32_1 = arith.constant 0 : i32
    return %c0_i32, %c0_i32_0 : i32, i32
  }
  func.func @transform_3(%arg0: i32) -> (i32, i32) {
    %c0_i32 = arith.constant 0 : i32
    %c0_i32_0 = arith.constant 0 : i32
    return %arg0, %c0_i32 : i32, i32
  }
}

</mosaic_0001>

<bundles_post_ra>
// kernel: tpu_custom_call.1
= control target key start
LH: loop header
LB: loop body
LE: loop exit
PB: predicated region body
PF: predicated region fallthrough
CT: control target
= control target key end

     0   :  { %vm32_vm0 = vcmask 1043456   ;;  %vm25_vm1 = vcmask 31744   ;;  %s204_s0 = inlined_call_operand.vmem [shape: f32[16,4], index: 0, kind: input, shape index: {}]   ;;  %s205_s1 = inlined_call_operand.vmem [shape: f32[4,128], index: 1, kind: input, shape index: {}]   ;;  %s206_s2 = inlined_call_operand.vmem [shape: f32[1,128], index: 2, kind: input, shape index: {}]   ;;  %s207_s3 = inlined_call_operand.hbm [shape: f32[16,128], index: 3, kind: output, shape index: {}]  }
   0x1   :  { %v17_v0 = vld [vmem:[%s205_s1] sm:$0xf]  ;;  %v16_v2 = vld [vmem:[%s204_s0 + $0x8] sm:$0xff] }
   0x2   :  { %v15_v1 = vld [vmem:[%s204_s0] sm:$0xff]  ;;  %136 = vmatprep.subr.msk.mxu0 %vm32_vm0, %v17_v0 }
   0x3   :  { %138 = vmatprep.mubr.msk.f32.mxu0 %vm25_vm1, %v15_v1 }
   0x4   :  { %8 = vsyncpa [#allocation3], 0  ;;  %137 = vmatpush3.msk.msra.mxu0 %vm32_vm0, %v17_v0  ;;  %v129_v3 = vld [vmem:[%s206_s2] ss:$0 sm:$0xff]  ;;  %s166_s1 = smov [#allocation2]  }
   0x5   :  { %139 = vmatmul.mubr.msk.f32.vlgmr.msra.gmra.mxu0 %vm25_vm1, %v16_v2  ;;  %s118_s20 = sshll.u32 %s166_s1, 4  ;;  %s119_s20 = int_to_ptr.vmem [resolvable:$true] %s118_s20 }
   0x6   :  { %s144_s21 = scalar_lea.vmem %s119_s20, 256  ;;  %p149_p1 = scmp.lt.s32.totalorder %s119_s20, %s119_s20 }
   0x7   :  { %p145_p0 = scmp.ne.s32.totalorder %s119_s20, %s144_s21  ;;  %p150_p2 = scmp.lt.s32.totalorder %s144_s21, %s144_s21 }
   0x9   :  { %p151_p3 = por %p150_p2, %p149_p1 }
   0xb   :  { %p152_p4 = pnand %p151_p3, %p145_p0 }
  0xc5   :  { %v140_v4 = vpop.f32.mrf.mxu0 }
  0xc6   :  { %v108_v5 = vadd.f32 %v140_v4, %v129_v3 }
  0xc7   :  { %v102_v6 = vpop.f32.mrf.mxu0 }
  0xc8   :  { %112 = vst [vmem:[#allocation2 + $0x8] sm:$0xff] %v108_v5  ;;  %v103_v7 = vadd.f32 %v129_v3, %v102_v6 }
  0xca   :  { %111 = vst [vmem:[#allocation2] sm:$0xff] %v103_v7 }
  0xcb   :  { %155 = shalt.err (!%p152_p4)
}
  0xcc   :  { %s167_s0 = smov 128   ;;  %s168_s22 = smov 8  }
  0xcd   :  { %124 = dma.vmem_to_hbm [thread:$0]  %s119_s20, 256, %s207_s3, [#allocation3], %s167_s0, %s167_s0, %s168_s22  }
  0xce   :  { %164 = dma.done.wait [#allocation3], 256  }
  0xcf   :  { %165 = vsyncadd [#allocation3], 4294967040 }
  0xd0   :  { %128 = vsyncpa [#allocation3], 1 }

</bundles_post_ra>
